<compile_context>
chip_gen: v7x
topology: tpu7x:2x2x1
jax: 0.10.0
libtpu: 0.0.40
codegen_flags: <defaults>
</compile_context>

<pallas_src>
import functools

import jax
import jax.numpy as jnp
from jax.experimental import pallas as pl
from jax.experimental.pallas import tpu as pltpu

block_size = 4
n_embed = 32
vocab_size = 65  # stand-in for len(sorted(set(tinychen))) -- synthetic, deterministic

_LANE = 128
_SUBLANE = 8


def _round_up(x, m):
    return ((x + m - 1) // m) * m


V_PAD = _round_up(vocab_size, _LANE)     # 65 -> 128 (lane-dense logits)
T_PAD = _round_up(block_size, _SUBLANE)  # 4  -> 8  (sublane-aligned pos table)


def bigram_fused_kernel(idx_ref, tokL_ref, posL_ref, o_ref, *, seq_len):
    """One grid step = TM rows of the flattened (B*T) batch.

    idx_ref  : (TM, 1)          int32  token ids
    tokL_ref : (V_PAD, V_PAD)   f32    emb_table @ W^T   (zero-padded)
    posL_ref : (T_PAD, V_PAD)   f32    pos_table @ W^T + b (zero-padded)
    o_ref    : (TM, V_PAD)      f32/bf16 logits tile (lane-dense)
    """
    tm = idx_ref.shape[0]
    vpad = tokL_ref.shape[0]
    tpad = posL_ref.shape[0]

    # Token one-hot -> MXU gather against the folded (token -> logits) table.
    tok_oh = (
        idx_ref[...] == jax.lax.broadcasted_iota(jnp.int32, (tm, vpad), 1)
    ).astype(jnp.float32)

    # Position ids generated in-kernel: global row index mod seq_len.
    row = pl.program_id(0) * tm + jax.lax.broadcasted_iota(jnp.int32, (tm, tpad), 0)
    pos_oh = (
        (row % seq_len) == jax.lax.broadcasted_iota(jnp.int32, (tm, tpad), 1)
    ).astype(jnp.float32)

    logits = jnp.dot(tok_oh, tokL_ref[...], preferred_element_type=jnp.float32)
    logits = logits + jnp.dot(pos_oh, posL_ref[...], preferred_element_type=jnp.float32)
    o_ref[...] = logits.astype(o_ref.dtype)


def prepare_params(emb_table, pos_table, lm_w, lm_b):
    """One-time parameter layout (hoisted off the per-call path):
    fold lm_head into the embedding tables, pad vocab axis to 128 lanes and
    positional table to a full sublane. Done once in f32."""
    w_t = lm_w.astype(jnp.float32).T                              # (C, V)
    tok_logits = emb_table.astype(jnp.float32) @ w_t              # (V, V)
    pos_logits = pos_table.astype(jnp.float32) @ w_t + lm_b.astype(jnp.float32)[None, :]

    tok_pad = jnp.zeros((V_PAD, V_PAD), jnp.float32).at[
        :vocab_size, :vocab_size].set(tok_logits)
    pos_pad = jnp.zeros((T_PAD, V_PAD), jnp.float32).at[
        :block_size, :vocab_size].set(pos_logits)
    return tok_pad, pos_pad


def _pick_tm(bt):
    """Row tile: multiple of 8 sublanes, <= 2048, and <= ~BT/2 so the
    parallel grid axis has >=2 steps when possible (v7x 2-TC sharding)."""
    bt8 = _round_up(bt, _SUBLANE)
    half = (bt8 // 2) // _SUBLANE * _SUBLANE
    return min(2048, max(_SUBLANE, half))


@functools.partial(jax.jit, static_argnames=("tm", "out_dtype"))
def _bigram_logits_padded(idx, tok_pad, pos_pad, *, tm, out_dtype):
    """Returns padded (BT_pad, V_PAD) logits. Pad columns are exactly zero;
    pad rows (>= B*T) are junk. No post-kernel slice copy here."""
    B, T = idx.shape
    BT = B * T
    BT_pad = _round_up(BT, tm)
    grid = BT_pad // tm

    # Per-call glue is only int32 token-id bookkeeping (a few dozen bytes).
    idx_flat = idx.reshape(BT).astype(jnp.int32)
    if BT_pad != BT:
        idx_flat = jnp.concatenate(
            [idx_flat, jnp.zeros((BT_pad - BT,), jnp.int32)])
    idx2d = idx_flat.reshape(BT_pad, 1)

    flops = 2 * BT_pad * V_PAD * (V_PAD + T_PAD)
    out_bytes = BT_pad * V_PAD * jnp.dtype(out_dtype).itemsize
    bytes_accessed = 4 * (idx2d.size + tok_pad.size + pos_pad.size) + out_bytes

    kernel = functools.partial(bigram_fused_kernel, seq_len=T)

    return pl.pallas_call(
        kernel,
        out_shape=jax.ShapeDtypeStruct((BT_pad, V_PAD), out_dtype),
        grid=(grid,),
        in_specs=[
            pl.BlockSpec((tm, 1), lambda i: (i, 0)),              # token ids
            pl.BlockSpec((V_PAD, V_PAD), lambda i: (0, 0)),       # folded tok->logits (resident)
            pl.BlockSpec((T_PAD, V_PAD), lambda i: (0, 0)),       # folded pos->logits+b (resident)
        ],
        out_specs=pl.BlockSpec((tm, V_PAD), lambda i: (i, 0)),
        compiler_params=pltpu.CompilerParams(
            dimension_semantics=("parallel",),
        ),
        cost_estimate=pl.CostEstimate(
            flops=flops, transcendentals=0, bytes_accessed=bytes_accessed),
    )(idx2d, tok_pad, pos_pad)


def bigram_forward(idx, params, targets=None, out_dtype=jnp.float32):
    """idx: (B, T) int32; params from prepare_params.
    Returns (logits (B, T, vocab_size), loss=None) -- module semantics.
    For writeback-bound downstream use, consume _bigram_logits_padded
    directly (no (BT, V) slice copy; pad columns are zero)."""
    B, T = idx.shape
    assert T <= block_size, "sequence length exceeds block_size"
    tm = _pick_tm(B * T)
    logits_pad = _bigram_logits_padded(idx, *params, tm=tm, out_dtype=out_dtype)
    logits = logits_pad[: B * T, :vocab_size].reshape(B, T, vocab_size)
    loss = None
    # TODO(synk): fused in-kernel cross-entropy (targets != None) not implemented.
    return logits, loss


if __name__ == "__main__":
    key = jax.random.PRNGKey(0)
    k_emb, k_pos, k_w, k_b, k_idx, k_idx2 = jax.random.split(key, 6)

    # Deterministic parameter init (shapes match nn.Embedding / nn.Linear).
    emb_table = jax.random.normal(k_emb, (vocab_size, n_embed), jnp.float32)
    pos_table = jax.random.normal(k_pos, (block_size, n_embed), jnp.float32)
    lm_w = jax.random.normal(k_w, (vocab_size, n_embed), jnp.float32) * 0.02
    lm_b = jax.random.normal(k_b, (vocab_size,), jnp.float32) * 0.02

    # One-time layout / head-folding work hoisted off the call path.
    params = prepare_params(emb_table, pos_table, lm_w, lm_b)
    params = jax.block_until_ready(params)

    def reference(idx):
        tok_r = jnp.take(emb_table, idx, axis=0)
        pos_r = jnp.take(pos_table, jnp.arange(idx.shape[1]), axis=0)
        return (tok_r + pos_r[None, :, :]) @ lm_w.T + lm_b

    # Small example input: batch=2, seq=block_size=4 (single grid step).
    B, T = 2, block_size
    idx = jax.random.randint(k_idx, (B, T), 0, vocab_size, dtype=jnp.int32)

    logits, loss = bigram_forward(idx, params)
    logits = jax.block_until_ready(logits)
    ref = reference(idx)
    assert logits.shape == (B, T, vocab_size)
    assert loss is None
    assert jnp.allclose(logits, ref, atol=1e-4, rtol=1e-4), "f32 mismatch vs reference"

    # Larger batch: exercises multi-step grid (tm=128, grid=2) + bf16 output
    # (recommended writeback-bound configuration on v5e/v6e/v7x).
    B2 = 64
    idx2 = jax.random.randint(k_idx2, (B2, T), 0, vocab_size, dtype=jnp.int32)
    logits2, _ = bigram_forward(idx2, params, out_dtype=jnp.bfloat16)
    logits2 = jax.block_until_ready(logits2)
    ref2 = reference(idx2)
    assert logits2.dtype == jnp.bfloat16
    assert jnp.allclose(logits2.astype(jnp.float32), ref2, atol=1e-2, rtol=1e-2), \
        "bf16 mismatch vs reference"

    print("KERNEL_OK")
</pallas_src>

<mosaic_0001>
module attributes {stable_mosaic.version = 11 : i64} {
  func.func @bigram_fused_kernel(%arg0: i32, %arg1: memref<8x1xi32, #tpu.memory_space<vmem>>, %arg2: memref<128x128xf32, #tpu.memory_space<vmem>>, %arg3: memref<8x128xf32, #tpu.memory_space<vmem>>, %arg4: memref<8x128xf32, #tpu.memory_space<vmem>>) attributes {dimension_semantics = [#tpu.dimension_semantics<parallel>], iteration_bounds = array<i64: 1>, scalar_prefetch = 0 : i64, scratch_operands = 0 : i64, tpu.core_type = #tpu.core_type<tc>, window_params = [{transform_indices = @transform_0, window_bounds = array<i64: 8, 1>}, {pipeline_mode = #tpu.pipeline_mode<synchronous>, transform_indices = @transform_1, window_bounds = array<i64: 128, 128>}, {pipeline_mode = #tpu.pipeline_mode<synchronous>, transform_indices = @transform_2, window_bounds = array<i64: 8, 128>}, {transform_indices = @transform_3, window_bounds = array<i64: 8, 128>}]} {
    %c0 = arith.constant 0 : index
    %c0_0 = arith.constant 0 : index
    %0 = vector.load %arg1[%c0, %c0_0] : memref<8x1xi32, #tpu.memory_space<vmem>>, vector<8x1xi32>
    %1 = tpu.iota {dimensions = array<i32: 1>} : vector<8x128xi32>
    %2 = vector.broadcast %0 : vector<8x1xi32> to vector<8x128xi32>
    %3 = arith.cmpi eq, %2, %1 : vector<8x128xi32>
    %4 = arith.extui %3 : vector<8x128xi1> to vector<8x128xi32>
    %5 = arith.sitofp %4 : vector<8x128xi32> to vector<8x128xf32>
    %c8_i32 = arith.constant 8 : i32
    %6 = arith.muli %arg0, %c8_i32 : i32
    %7 = tpu.iota {dimensions = array<i32: 0>} : vector<8x8xi32>
    %8 = vector.broadcast %6 : i32 to vector<8x8xi32>
    %9 = arith.addi %8, %7 : vector<8x8xi32>
    %c4_i32 = arith.constant 4 : i32
    %c0_i32 = arith.constant 0 : i32
    %10 = arith.cmpi eq, %c4_i32, %c0_i32 : i32
    %c1_i32 = arith.constant 1 : i32
    %11 = arith.select %10, %c1_i32, %c4_i32 : i32
    %12 = vector.broadcast %11 : i32 to vector<8x8xi32>
    %13 = arith.remsi %9, %12 : vector<8x8xi32>
    %c0_i32_1 = arith.constant 0 : i32
    %14 = vector.broadcast %c0_i32_1 : i32 to vector<8x8xi32>
    %15 = arith.cmpi ne, %13, %14 : vector<8x8xi32>
    %c0_i32_2 = arith.constant 0 : i32
    %16 = vector.broadcast %c0_i32_2 : i32 to vector<8x8xi32>
    %17 = arith.cmpi slt, %13, %16 : vector<8x8xi32>
    %c0_i32_3 = arith.constant 0 : i32
    %18 = arith.cmpi slt, %11, %c0_i32_3 : i32
    %19 = vector.broadcast %18 : i1 to vector<8x8xi1>
    %20 = vector.broadcast %19 : vector<8x8xi1> to vector<8x8xi1>
    %21 = arith.xori %17, %20 : vector<8x8xi1>
    %22 = arith.andi %21, %15 : vector<8x8xi1>
    %23 = vector.broadcast %11 : i32 to vector<8x8xi32>
    %24 = arith.addi %13, %23 : vector<8x8xi32>
    %25 = arith.select %22, %24, %13 : vector<8x8xi1>, vector<8x8xi32>
    %26 = tpu.iota {dimensions = array<i32: 1>} : vector<8x8xi32>
    %27 = arith.cmpi eq, %25, %26 : vector<8x8xi32>
    %28 = arith.extui %27 : vector<8x8xi1> to vector<8x8xi32>
    %29 = arith.sitofp %28 : vector<8x8xi32> to vector<8x8xf32>
    %c0_4 = arith.constant 0 : index
    %c0_5 = arith.constant 0 : index
    %30 = vector.load %arg2[%c0_4, %c0_5] : memref<128x128xf32, #tpu.memory_space<vmem>>, vector<128x128xf32>
    %cst = arith.constant dense<0.000000e+00> : vector<8x128xf32>
    %31 = tpu.matmul %5, %30, %cst {dimension_numbers = #tpu.dot_dimension_numbers<[1], [0], [0], [1], [0, 0, 1, 1], [], []>} : vector<8x128xf32>, vector<128x128xf32>, vector<8x128xf32> -> vector<8x128xf32>
    %c0_6 = arith.constant 0 : index
    %c0_7 = arith.constant 0 : index
    %32 = vector.load %arg3[%c0_6, %c0_7] : memref<8x128xf32, #tpu.memory_space<vmem>>, vector<8x128xf32>
    %cst_8 = arith.constant dense<0.000000e+00> : vector<8x128xf32>
    %33 = tpu.matmul %29, %32, %cst_8 {dimension_numbers = #tpu.dot_dimension_numbers<[1], [0], [0], [1], [0, 0, 1, 1], [], []>} : vector<8x8xf32>, vector<8x128xf32>, vector<8x128xf32> -> vector<8x128xf32>
    %34 = arith.addf %31, %33 : vector<8x128xf32>
    %c0_9 = arith.constant 0 : index
    %c0_10 = arith.constant 0 : index
    %35 = vector.load %arg4[%c0_9, %c0_10] : memref<8x128xf32, #tpu.memory_space<vmem>>, vector<8x128xf32>
    tpu.vector_store %arg4[%c0_9, %c0_10], %34 {strides = array<i32>} : memref<8x128xf32, #tpu.memory_space<vmem>>, vector<8x128xf32>,
    return
  }
  func.func @transform_0(%arg0: i32) -> (i32, i32) {
    %c0_i32 = arith.constant 0 : i32
    %c0_i32_0 = arith.constant 0 : i32
    return %arg0, %c0_i32 : i32, i32
  }
  func.func @transform_1(%arg0: i32) -> (i32, i32) {
    %c0_i32 = arith.constant 0 : i32
    %c0_i32_0 = arith.constant 0 : i32
    %c0_i32_1 = arith.constant 0 : i32
    return %c0_i32, %c0_i32_0 : i32, i32
  }
  func.func @transform_2(%arg0: i32) -> (i32, i32) {
    %c0_i32 = arith.constant 0 : i32
    %c0_i32_0 = arith.constant 0 : i32
    %c0_i32_1 = arith.constant 0 : i32
    return %c0_i32, %c0_i32_0 : i32, i32
  }
  func.func @transform_3(%arg0: i32) -> (i32, i32) {
    %c0_i32 = arith.constant 0 : i32
    %c0_i32_0 = arith.constant 0 : i32
    return %arg0, %c0_i32 : i32, i32
  }
}

</mosaic_0001>

<bundles_post_ra>
// kernel: _bigram_logits_padded.1
= control target key start
LH: loop header
LB: loop body
LE: loop exit
PB: predicated region body
PF: predicated region fallthrough
CT: control target
= control target key end

     0   :  { %8 = vsyncpa [#allocation3], 0  ;;  %s440_s0 = inlined_call_operand.vmem [shape: s32[8,1], index: 0, kind: input, shape index: {}]   ;;  %s441_s1 = inlined_call_operand.hbm [shape: f32[128,128], index: 1, kind: input, shape index: {}]   ;;  %s442_s2 = inlined_call_operand.vmem [shape: f32[8,128], index: 2, kind: input, shape index: {}]   ;;  %s443_s3 = inlined_call_operand.hbm [shape: f32[8,128], index: 3, kind: output, shape index: {}]  }
   0x1   :  { %9 = vsyncpa [#allocation4], 0  ;;  %s381_s12 = smov [#allocation2]   ;;  %s333_s16 = scalar_lea.hbm %s441_s1, 2048 }
   0x2   :  { %s17_s13 = sshll.u32 %s381_s12, 4  ;;  %p334_p0 = scmp.ne.s32.totalorder %s441_s1, %s333_s16  ;;  %s18_s13 = int_to_ptr.vmem [resolvable:$true] %s17_s13 }
   0x3   :  { %p337_p1 = scmp.lt.u32.totalorder %s333_s16, %s441_s1 }
   0x5   :  { %p339_p2 = pnand %p337_p1, %p334_p0 }
   0x7   :  { %342 = shalt.err (!%p339_p2)
}
   0x8   :  { %s343_s21 = scalar_lea.vmem %s18_s13, 2048  ;;  %p348_p4 = scmp.lt.s32.totalorder %s18_s13, %s18_s13 }
   0x9   :  { %p344_p3 = scmp.ne.s32.totalorder %s18_s13, %s343_s21  ;;  %p349_p5 = scmp.lt.s32.totalorder %s343_s21, %s343_s21 }
   0xb   :  { %p350_p6 = por %p349_p5, %p348_p4 }
   0xd   :  { %p351_p7 = pnand %p350_p6, %p344_p3 }
   0xf   :  { %354 = shalt.err (!%p351_p7)
}
  0x10   :  { %s382_s22 = smov 128   ;;  %s383_s23 = smov 8  }
  0x11   :  { %23 = dma.hbm_to_vmem [thread:$0]  %s441_s1, 2048, %s18_s13, [#allocation3], %s382_s22, %s382_s22, %s383_s23  }
  0x12   :  { %377 = dma.done.wait [#allocation3], 2048  }
  0x13   :  { %378 = vsyncadd [#allocation3], 4294965248  ;;  %v384_v0 = vmov 0   ;;  %v385_v1 = vmov 0.0|0.0   ;;  %v30_v2 = vlaneseq  ;;  %v386_v3 = vmov 0.0   ;;  %v29_v7 = vld [vmem:[%s440_s0] sm:$0xff] }
  0x14   :  { %332 = vset.pattern.permute.xlu0 %v384_v0  ;;  %298 = vmatprep.subr.bf16.mxu0 %v385_v1  ;;  %vm387_vm0 = vmmov 0   ;;  %v58_v8 = vld [vmem:[#allocation2] sm:$0xff]  ;;  %v59_v9 = vld [vmem:[#allocation2 + $0x8] sm:$0xff]  ;;  %v60_v11 = vld [vmem:[#allocation2 + $0x10] sm:$0xff]  ;;  %vm75_vm2 = vcmask 64512   ;;  %v388_v35 = vmov 1.0  }
  0x15   :  { %258 = vmatprep.subr.mxu1 %v386_v3  ;;  %260 = vmatprep.mubr.msk.f32.mxu1 %vm387_vm0, %v386_v3  ;;  %v40_v4 = vshrl.u32 %v30_v2, 7  ;;  %v31_v5 = vand.u32 127, %v30_v2  ;;  %v299_v10 = vpack.c.bf16 %v59_v9, %v58_v8  ;;  %v61_v12 = vld [vmem:[#allocation2 + $0x18] sm:$0xff]  ;;  %v62_v14 = vld [vmem:[#allocation2 + $0x20] sm:$0xff]  ;;  %v63_v15 = vld [vmem:[#allocation2 + $0x28] sm:$0xff]  ;;  %s389_s0 = smov [#allocation5]  }
  0x16   :  { %295 = vmatprep.mubr.msk.f32.mxu0 %vm387_vm0, %v386_v3  ;;  %33 = vperm.xlu0 %332, %v29_v7   ;;  %v302_v13 = vpack.c.bf16 %v61_v12, %v60_v11  ;;  %v74_v17 = vld [vmem:[%s442_s2] sm:$0xff]  ;;  %v305_v18 = vpack.c.bf16 %v63_v15, %v62_v14  ;;  %v65_v20 = vld [vmem:[#allocation2 + $0x38] sm:$0xff]  ;;  %v66_v22 = vld [vmem:[#allocation2 + $0x40] sm:$0xff]  ;;  %s226_s2 = sshll.u32 %s389_s0, 4  ;;  %s227_s2 = int_to_ptr.vmem [resolvable:$true] %s226_s2 }
  0x17   :  { %v47_v6 = vand.u32 3, %v40_v4  ;;  %300 = vmatpush3.bf16.msra.mxu0 %v299_v10  ;;  %259 = vmatpush3.msra.mxu1 %v74_v17  ;;  %v64_v19 = vld [vmem:[#allocation2 + $0x30] sm:$0xff]  ;;  %v67_v23 = vld [vmem:[#allocation2 + $0x48] sm:$0xff]  ;;  %v69_v26 = vld [vmem:[#allocation2 + $0x58] sm:$0xff]  ;;  %s355_s29 = scalar_lea.vmem %s227_s2, 128  ;;  %p360_p9 = scmp.lt.s32.totalorder %s227_s2, %s227_s2 }
  0x18   :  { %301 = vmatprep.subr.bf16.mxu0 %v385_v1  ;;  %v308_v21 = vpack.c.bf16 %v65_v20, %v64_v19  ;;  %v311_v24 = vpack.c.bf16 %v67_v23, %v66_v22  ;;  %v68_v25 = vld [vmem:[#allocation2 + $0x50] sm:$0xff]  ;;  %v70_v28 = vld [vmem:[#allocation2 + $0x60] sm:$0xff]  ;;  %v71_v29 = vld [vmem:[#allocation2 + $0x68] sm:$0xff]  ;;  %p356_p8 = scmp.ne.s32.totalorder %s227_s2, %s355_s29  ;;  %p361_p10 = scmp.lt.s32.totalorder %s355_s29, %s355_s29 }
  0x19   :  { %vm55_vm1 = vcmp.eq.s32.totalorder %v47_v6, %v31_v5  ;;  %v314_v27 = vpack.c.bf16 %v69_v26, %v68_v25  ;;  %v317_v30 = vpack.c.bf16 %v71_v29, %v70_v28  ;;  %v72_v31 = vld [vmem:[#allocation2 + $0x70] sm:$0xff]  ;;  %v73_v32 = vld [vmem:[#allocation2 + $0x78] sm:$0xff] }
  0x1a   :  { %v236_v16 = vsel %vm55_vm1, 1.0, %v386_v3  ;;  %v320_v33 = vpack.c.bf16 %v73_v32, %v72_v31  ;;  %p362_p11 = por %p361_p10, %p360_p9 }
  0x1b   :  { %303 = vmatpush3.bf16.msra.mxu0 %v302_v13  ;;  %261 = vmatmul.mubr.msk.f32.vlgmr.msra.gmra.mrb[0].mxu1 %vm75_vm2, %v236_v16 }
  0x1c   :  { %304 = vmatprep.subr.bf16.mxu0 %v385_v1  ;;  %p363_p12 = pnand %p362_p11, %p356_p8 }
  0x1f   :  { %306 = vmatpush3.bf16.msra.mxu0 %v305_v18 }
  0x20   :  { %307 = vmatprep.subr.bf16.mxu0 %v385_v1 }
  0x23   :  { %309 = vmatpush3.bf16.msra.mxu0 %v308_v21 }
  0x24   :  { %310 = vmatprep.subr.bf16.mxu0 %v385_v1 }
  0x27   :  { %312 = vmatpush3.bf16.msra.mxu0 %v311_v24 }
  0x28   :  { %313 = vmatprep.subr.bf16.mxu0 %v385_v1 }
  0x2b   :  { %315 = vmatpush3.bf16.msra.mxu0 %v314_v27 }
  0x2c   :  { %316 = vmatprep.subr.bf16.mxu0 %v385_v1 }
  0x2f   :  { %318 = vmatpush3.bf16.msra.mxu0 %v317_v30 }
  0x30   :  { %319 = vmatprep.subr.bf16.mxu0 %v385_v1 }
  0x33   :  { %321 = vmatpush3.bf16.msra.mxu0 %v320_v33 }
  0x95   :  { %v34_v34 = vpop.permute.xlu0 %33 }
  0x96   :  { %vm35_vm3 = vcmp.eq.s32.totalorder %v34_v34, %v31_v5 }
  0x97   :  { %296 = vmatmul.mubr.msk.f32.vlgmr.msra.gmra.mrb[0].mxu0 %vm35_vm3, %v388_v35 }
  0xee   :  { %v145_v36 = vpop.f32.mrb[0].mxu1 }
  0xef   :  { %v262_v37 = vpop.f32.mrb[1].mxu1 }
 0x16a   :  { %v215_v38 = vpop.f32.mrb[0].mxu0 }
 0x16b   :  { %v216_v39 = vadd.f32 %v215_v38, %v145_v36  ;;  %v297_v40 = vpop.f32.mrb[1].mxu0 }
 0x16d   :  { %219 = vst [vmem:[#allocation5] sm:$0xff] %v216_v39 }
 0x16e   :  { %366 = shalt.err (!%p363_p12)
}
 0x16f   :  { %s367_s5 = scalar_lea.hbm %s443_s3, 128 }
 0x170   :  { %p368_p13 = scmp.ne.s32.totalorder %s443_s3, %s367_s5  ;;  %p371_p0 = scmp.lt.u32.totalorder %s367_s5, %s443_s3 }
 0x172   :  { %p373_p1 = pnand %p371_p0, %p368_p13 }
 0x174   :  { %376 = shalt.err (!%p373_p1)
}
 0x175   :  { %229 = dma.vmem_to_hbm [thread:$0]  %s227_s2, 128, %s443_s3, [#allocation4]  }
 0x176   :  { %379 = dma.done.wait [#allocation4], 128  }
 0x177   :  { %380 = vsyncadd [#allocation4], 4294967168 }
 0x178   :  { %233 = vsyncpa [#allocation3], 1 }
 0x179   :  { %234 = vsyncpa [#allocation4], 1 }

</bundles_post_ra>
